<compile_context>
chip_gen: v6e
topology: v6e:2x2x1
jax: 0.10.0
libtpu: 0.0.40
codegen_flags: <defaults>
</compile_context>

<pallas_src>
import jax
import jax.numpy as jnp
from jax.experimental import pallas as pl
from jax.experimental.pallas import tpu as pltpu


def _edge_kernel(x_ref, bx_ref, by_ref, out_ref):
    # x_ref : (G, H, W) block of planes (plane = one (n, c) image channel)
    # bx_ref/by_ref : full (P, 1, 1) per-plane conv biases (loaded once)
    # out_ref: (G, H, W)
    i = pl.program_id(0)
    x = x_ref[...]
    G, H, W = x.shape

    # Rank-reduced boundary masks (0/1 in x.dtype), computed once and reused.
    row = jax.lax.broadcasted_iota(jnp.int32, (1, H, 1), 1)
    col = jax.lax.broadcasted_iota(jnp.int32, (1, 1, W), 2)
    row_m1 = (row >= 1).astype(x.dtype)       # valid source for x[i-1, :]
    row_p1 = (row < H - 1).astype(x.dtype)    # valid source for x[i+1, :]
    col_m1 = (col >= 1).astype(x.dtype)       # valid source for x[:, j-1]
    col_p1 = (col < W - 1).astype(x.dtype)    # valid source for x[:, j+1]

    # Shared sublane (row) shifts with zero halo (only 2 sublane rolls total).
    up = pltpu.roll(x, shift=1, axis=1) * row_m1       # x[i-1, j], 0 at i == 0
    dn = pltpu.roll(x, shift=H - 1, axis=1) * row_p1   # x[i+1, j], 0 at i == H-1

    v = up + 2.0 * x + dn      # vertical smooth  -> horizontal gradient (gx)
    d = up - dn                # vertical diff    -> vertical gradient  (gy)

    # Per-plane conv biases, sliced from the once-loaded (P, 1, 1) arrays.
    bx = bx_ref[pl.ds(i * G, G)]              # (G, 1, 1)
    by = by_ref[pl.ds(i * G, G)]              # (G, 1, 1)

    # Separable Sobel, cross-correlation with zero padding=1 (as nn.Conv2d):
    #   gx[i, j] = v[i, j-1] - v[i, j+1]
    #   gy[i, j] = d[i, j-1] + 2 d[i, j] + d[i, j+1]
    vl = pltpu.roll(v, shift=1, axis=2) * col_m1
    vr = pltpu.roll(v, shift=W - 1, axis=2) * col_p1
    gx = vl - vr + bx
    acc = gx * gx                              # accumulate in place-ish

    dl = pltpu.roll(d, shift=1, axis=2) * col_m1
    dr = pltpu.roll(d, shift=W - 1, axis=2) * col_p1
    gy = dl + 2.0 * d + dr + by
    acc = acc + gy * gy

    mag = jnp.sqrt(acc)

    # Per-plane amax over (H, W): lane reduce then sublane reduce.
    m = jnp.max(mag, axis=2, keepdims=True)    # (G, H, 1)
    m = jnp.max(m, axis=1, keepdims=True)      # (G, 1, 1)

    # One exact reciprocal per plane + broadcast multiply (no per-element div).
    out_ref[...] = (mag * pl.reciprocal(m)).astype(out_ref.dtype)


def _choose_planes_per_step(num_planes, plane_bytes, target_bytes):
    """Largest divisor of num_planes whose block fits the byte target.

    Prefers divisors giving an even grid length (two TensorCores on v7x),
    then >= 2 grid steps, then simply the largest fitting block.
    """
    divisors = [g for g in range(1, num_planes + 1) if num_planes % g == 0]
    fitting = [g for g in divisors if g * plane_bytes <= target_bytes]
    if not fitting:
        # A single plane exceeds the target; fall back to one plane per step.
        return 1
    even_grid = [g for g in fitting if (num_planes // g) % 2 == 0]
    multi_step = [g for g in fitting if (num_planes // g) >= 2]
    if even_grid:
        return max(even_grid)
    if multi_step:
        return max(multi_step)
    return max(fitting)


def edge_kernel_forward(x, bias_x, bias_y, *, target_block_bytes=2 * 1024 * 1024):
    """x: (N, C, H, W) float32; bias_x / bias_y: (C,) float32."""
    N, C, H, W = x.shape
    P = N * C

    # Fuse (N, C) into one plane axis (free, row-major reshape).
    xf = x.reshape(P, H, W)
    bx = jnp.tile(bias_x.astype(x.dtype), N).reshape(P, 1, 1)
    by = jnp.tile(bias_y.astype(x.dtype), N).reshape(P, 1, 1)

    plane_bytes = H * W * x.dtype.itemsize
    G = _choose_planes_per_step(P, plane_bytes, target_block_bytes)
    grid = (P // G,)
    block_bytes = G * plane_bytes

    # Explicit VMEM budget: 2x double-buffered input + 2x output + ~6 live
    # full-size temporaries + the once-loaded (padded) bias arrays + headroom.
    bias_bytes = 2 * 2 * P * 4096
    vmem_limit = int(min(64 * 1024 * 1024,
                         max(32 * 1024 * 1024,
                             12 * block_bytes + bias_bytes + (2 << 20))))

    grid_spec = pltpu.PrefetchScalarGridSpec(
        num_scalar_prefetch=0,
        grid=grid,
        in_specs=[
            pl.BlockSpec((G, H, W), lambda i: (i, 0, 0)),
            # Constant index_map: the bias arrays are DMA'd once and revisited.
            pl.BlockSpec((P, 1, 1), lambda i: (0, 0, 0)),
            pl.BlockSpec((P, 1, 1), lambda i: (0, 0, 0)),
        ],
        out_specs=pl.BlockSpec((G, H, W), lambda i: (i, 0, 0)),
    )

    out = pl.pallas_call(
        _edge_kernel,
        out_shape=jax.ShapeDtypeStruct((P, H, W), x.dtype),
        grid_spec=grid_spec,
        compiler_params=pltpu.CompilerParams(
            dimension_semantics=("parallel",),
            vmem_limit_bytes=vmem_limit,
        ),
    )(xf, bx, by)

    return out.reshape(N, C, H, W)


def _reference(x, bias_x, bias_y):
    """Pure-JAX reference with identical semantics to the PyTorch module."""
    N, C, H, W = x.shape
    xp = jnp.pad(x, ((0, 0), (0, 0), (1, 1), (1, 1)))

    def sh(dy, dx):
        return xp[:, :, dy:dy + H, dx:dx + W]

    gx = (sh(0, 0) - sh(0, 2)) + 2.0 * (sh(1, 0) - sh(1, 2)) + (sh(2, 0) - sh(2, 2))
    gx = gx + bias_x[None, :, None, None]
    gy = (sh(0, 0) + 2.0 * sh(0, 1) + sh(0, 2)) - (sh(2, 0) + 2.0 * sh(2, 1) + sh(2, 2))
    gy = gy + bias_y[None, :, None, None]
    mag = jnp.sqrt(gx * gx + gy * gy)
    return mag / jnp.max(mag, axis=(2, 3), keepdims=True)


if __name__ == "__main__":
    key = jax.random.PRNGKey(0)
    k_x, k_bx, k_by = jax.random.split(key, 3)

    N, C, H, W = 2, 3, 16, 16  # channels=3 as in the module default
    x = jax.random.uniform(k_x, (N, C, H, W), dtype=jnp.float32)

    # Deterministic stand-ins for the (un-zeroed) Conv2d biases; fan_in = C*3*3.
    bound = 1.0 / jnp.sqrt(jnp.float32(C * 3 * 3))
    bias_x = jax.random.uniform(k_bx, (C,), jnp.float32, -bound, bound)
    bias_y = jax.random.uniform(k_by, (C,), jnp.float32, -bound, bound)

    out = edge_kernel_forward(x, bias_x, bias_y)
    out = jax.block_until_ready(out)

    ref = _reference(x, bias_x, bias_y)
    assert out.shape == (N, C, H, W)
    assert jnp.allclose(out, ref, atol=1e-5, rtol=1e-5), "mismatch vs reference"

    print("KERNEL_OK")
</pallas_src>

<mosaic_0001>
module attributes {stable_mosaic.version = 11 : i64} {
  func.func @_edge_kernel(%arg0: i32, %arg1: memref<3x16x16xf32, #tpu.memory_space<vmem>>, %arg2: memref<6x1x1xf32, #tpu.memory_space<vmem>>, %arg3: memref<6x1x1xf32, #tpu.memory_space<vmem>>, %arg4: memref<3x16x16xf32, #tpu.memory_space<vmem>>) attributes {dimension_semantics = [#tpu.dimension_semantics<parallel>], iteration_bounds = array<i64: 2>, scalar_prefetch = 0 : i64, scratch_operands = 0 : i64, tpu.core_type = #tpu.core_type<tc>, window_params = [{transform_indices = @transform_0, window_bounds = array<i64: 3, 16, 16>}, {pipeline_mode = #tpu.pipeline_mode<synchronous>, transform_indices = @transform_1, window_bounds = array<i64: 6, 1, 1>}, {pipeline_mode = #tpu.pipeline_mode<synchronous>, transform_indices = @transform_2, window_bounds = array<i64: 6, 1, 1>}, {transform_indices = @transform_3, window_bounds = array<i64: 3, 16, 16>}]} {
    %c0 = arith.constant 0 : index
    %c0_0 = arith.constant 0 : index
    %c0_1 = arith.constant 0 : index
    %0 = vector.load %arg1[%c0, %c0_0, %c0_1] : memref<3x16x16xf32, #tpu.memory_space<vmem>>, vector<3x16x16xf32>
    %1 = tpu.iota {dimensions = array<i32: 1>} : vector<1x16x1xi32>
    %2 = tpu.iota {dimensions = array<i32: 2>} : vector<1x1x16xi32>
    %c1_i32 = arith.constant 1 : i32
    %3 = vector.broadcast %c1_i32 : i32 to vector<1x16x1xi32>
    %4 = arith.cmpi sge, %1, %3 : vector<1x16x1xi32>
    %5 = arith.extui %4 : vector<1x16x1xi1> to vector<1x16x1xi32>
    %6 = arith.sitofp %5 : vector<1x16x1xi32> to vector<1x16x1xf32>
    %c15_i32 = arith.constant 15 : i32
    %7 = vector.broadcast %c15_i32 : i32 to vector<1x16x1xi32>
    %8 = arith.cmpi slt, %1, %7 : vector<1x16x1xi32>
    %9 = arith.extui %8 : vector<1x16x1xi1> to vector<1x16x1xi32>
    %10 = arith.sitofp %9 : vector<1x16x1xi32> to vector<1x16x1xf32>
    %c1_i32_2 = arith.constant 1 : i32
    %11 = vector.broadcast %c1_i32_2 : i32 to vector<1x1x16xi32>
    %12 = arith.cmpi sge, %2, %11 : vector<1x1x16xi32>
    %13 = arith.extui %12 : vector<1x1x16xi1> to vector<1x1x16xi32>
    %14 = arith.sitofp %13 : vector<1x1x16xi32> to vector<1x1x16xf32>
    %c15_i32_3 = arith.constant 15 : i32
    %15 = vector.broadcast %c15_i32_3 : i32 to vector<1x1x16xi32>
    %16 = arith.cmpi slt, %2, %15 : vector<1x1x16xi32>
    %17 = arith.extui %16 : vector<1x1x16xi1> to vector<1x1x16xi32>
    %18 = arith.sitofp %17 : vector<1x1x16xi32> to vector<1x1x16xf32>
    %c1_i32_4 = arith.constant 1 : i32
    %19 = tpu.dynamic_rotate %0 by %c1_i32_4 dim 1 : vector<3x16x16xf32>, i32 -> vector<3x16x16xf32>
    %20 = vector.broadcast %6 : vector<1x16x1xf32> to vector<3x16x16xf32>
    %21 = arith.mulf %19, %20 : vector<3x16x16xf32>
    %c15_i32_5 = arith.constant 15 : i32
    %22 = tpu.dynamic_rotate %0 by %c15_i32_5 dim 1 : vector<3x16x16xf32>, i32 -> vector<3x16x16xf32>
    %23 = vector.broadcast %10 : vector<1x16x1xf32> to vector<3x16x16xf32>
    %24 = arith.mulf %22, %23 : vector<3x16x16xf32>
    %cst = arith.constant 2.000000e+00 : f32
    %25 = vector.broadcast %cst : f32 to vector<3x16x16xf32>
    %26 = arith.mulf %25, %0 : vector<3x16x16xf32>
    %27 = arith.addf %21, %26 : vector<3x16x16xf32>
    %28 = arith.addf %27, %24 : vector<3x16x16xf32>
    %29 = arith.subf %21, %24 : vector<3x16x16xf32>
    %c3_i32 = arith.constant 3 : i32
    %30 = arith.muli %arg0, %c3_i32 : i32
    %31 = arith.index_cast %30 : i32 to index
    %c0_6 = arith.constant 0 : index
    %c0_7 = arith.constant 0 : index
    %32 = vector.load %arg2[%31, %c0_6, %c0_7] : memref<6x1x1xf32, #tpu.memory_space<vmem>>, vector<3x1x1xf32>
    %c3_i32_8 = arith.constant 3 : i32
    %33 = arith.muli %arg0, %c3_i32_8 : i32
    %34 = arith.index_cast %33 : i32 to index
    %c0_9 = arith.constant 0 : index
    %c0_10 = arith.constant 0 : index
    %35 = vector.load %arg3[%34, %c0_9, %c0_10] : memref<6x1x1xf32, #tpu.memory_space<vmem>>, vector<3x1x1xf32>
    %c1_i32_11 = arith.constant 1 : i32
    %36 = tpu.dynamic_rotate %28 by %c1_i32_11 dim 2 : vector<3x16x16xf32>, i32 -> vector<3x16x16xf32>
    %37 = vector.broadcast %14 : vector<1x1x16xf32> to vector<3x16x16xf32>
    %38 = arith.mulf %36, %37 : vector<3x16x16xf32>
    %c15_i32_12 = arith.constant 15 : i32
    %39 = tpu.dynamic_rotate %28 by %c15_i32_12 dim 2 : vector<3x16x16xf32>, i32 -> vector<3x16x16xf32>
    %40 = vector.broadcast %18 : vector<1x1x16xf32> to vector<3x16x16xf32>
    %41 = arith.mulf %39, %40 : vector<3x16x16xf32>
    %42 = arith.subf %38, %41 : vector<3x16x16xf32>
    %43 = vector.broadcast %32 : vector<3x1x1xf32> to vector<3x16x16xf32>
    %44 = arith.addf %42, %43 : vector<3x16x16xf32>
    %45 = arith.mulf %44, %44 : vector<3x16x16xf32>
    %c1_i32_13 = arith.constant 1 : i32
    %46 = tpu.dynamic_rotate %29 by %c1_i32_13 dim 2 : vector<3x16x16xf32>, i32 -> vector<3x16x16xf32>
    %47 = vector.broadcast %14 : vector<1x1x16xf32> to vector<3x16x16xf32>
    %48 = arith.mulf %46, %47 : vector<3x16x16xf32>
    %c15_i32_14 = arith.constant 15 : i32
    %49 = tpu.dynamic_rotate %29 by %c15_i32_14 dim 2 : vector<3x16x16xf32>, i32 -> vector<3x16x16xf32>
    %50 = vector.broadcast %18 : vector<1x1x16xf32> to vector<3x16x16xf32>
    %51 = arith.mulf %49, %50 : vector<3x16x16xf32>
    %cst_15 = arith.constant 2.000000e+00 : f32
    %52 = vector.broadcast %cst_15 : f32 to vector<3x16x16xf32>
    %53 = arith.mulf %52, %29 : vector<3x16x16xf32>
    %54 = arith.addf %48, %53 : vector<3x16x16xf32>
    %55 = arith.addf %54, %51 : vector<3x16x16xf32>
    %56 = vector.broadcast %35 : vector<3x1x1xf32> to vector<3x16x16xf32>
    %57 = arith.addf %55, %56 : vector<3x16x16xf32>
    %58 = arith.mulf %57, %57 : vector<3x16x16xf32>
    %59 = arith.addf %45, %58 : vector<3x16x16xf32>
    %60 = math.sqrt %59 : vector<3x16x16xf32>
    %cst_16 = arith.constant dense<0xFF800000> : vector<3x16xf32>
    %61 = vector.multi_reduction <maximumf>, %60, %cst_16 [2] : vector<3x16x16xf32> to vector<3x16xf32>
    %62 = vector.shape_cast %61 : vector<3x16xf32> to vector<3x16x1xf32>
    %cst_17 = arith.constant dense<0xFF800000> : vector<3x1xf32>
    %63 = vector.multi_reduction <maximumf>, %62, %cst_17 [1] : vector<3x16x1xf32> to vector<3x1xf32>
    %64 = vector.shape_cast %63 : vector<3x1xf32> to vector<3x1x1xf32>
    %65 = tpu.reciprocal %64 : vector<3x1x1xf32> -> vector<3x1x1xf32>
    %66 = vector.broadcast %65 : vector<3x1x1xf32> to vector<3x16x16xf32>
    %67 = arith.mulf %60, %66 : vector<3x16x16xf32>
    %c0_18 = arith.constant 0 : index
    %c0_19 = arith.constant 0 : index
    %c0_20 = arith.constant 0 : index
    %68 = vector.load %arg4[%c0_18, %c0_19, %c0_20] : memref<3x16x16xf32, #tpu.memory_space<vmem>>, vector<3x16x16xf32>
    tpu.vector_store %arg4[%c0_18, %c0_19, %c0_20], %67 {strides = array<i32>} : memref<3x16x16xf32, #tpu.memory_space<vmem>>, vector<3x16x16xf32>,
    return
  }
  func.func @transform_0(%arg0: i32) -> (i32, i32, i32) {
    %c0_i32 = arith.constant 0 : i32
    %c0_i32_0 = arith.constant 0 : i32
    %c0_i32_1 = arith.constant 0 : i32
    return %arg0, %c0_i32, %c0_i32_0 : i32, i32, i32
  }
  func.func @transform_1(%arg0: i32) -> (i32, i32, i32) {
    %c0_i32 = arith.constant 0 : i32
    %c0_i32_0 = arith.constant 0 : i32
    %c0_i32_1 = arith.constant 0 : i32
    %c0_i32_2 = arith.constant 0 : i32
    return %c0_i32, %c0_i32_0, %c0_i32_1 : i32, i32, i32
  }
  func.func @transform_2(%arg0: i32) -> (i32, i32, i32) {
    %c0_i32 = arith.constant 0 : i32
    %c0_i32_0 = arith.constant 0 : i32
    %c0_i32_1 = arith.constant 0 : i32
    %c0_i32_2 = arith.constant 0 : i32
    return %c0_i32, %c0_i32_0, %c0_i32_1 : i32, i32, i32
  }
  func.func @transform_3(%arg0: i32) -> (i32, i32, i32) {
    %c0_i32 = arith.constant 0 : i32
    %c0_i32_0 = arith.constant 0 : i32
    %c0_i32_1 = arith.constant 0 : i32
    return %arg0, %c0_i32, %c0_i32_0 : i32, i32, i32
  }
}

</mosaic_0001>

<bundles_post_ra>
// kernel: tpu_custom_call.1
= control target key start
LH: loop header
LB: loop body
LE: loop exit
PB: predicated region body
PF: predicated region fallthrough
CT: control target
= control target key end

     0   :  { %8 = vsyncpa [#allocation3], 0  ;;  %s1403_s0 = inlined_call_operand.hbm [shape: f32[6,16,16], index: 0, kind: input, shape index: {}]   ;;  %s1404_s1 = inlined_call_operand.vmem [shape: f32[6,1,1], index: 1, kind: input, shape index: {}]   ;;  %s1405_s2 = inlined_call_operand.vmem [shape: f32[6,1,1], index: 2, kind: input, shape index: {}]   ;;  %s1406_s3 = inlined_call_operand.hbm [shape: f32[6,16,16], index: 3, kind: output, shape index: {}]  }
   0x1   :  { %10 = vsyncpa [#allocation3 + $0x1], 0 }
   0x2   :  { %11 = vsyncpa [#allocation4], 0 }
   0x3   :  { %13 = vsyncpa [#allocation4 + $0x1], 0  ;;  %s1023_s12 = smov 0   ;;  %s1025_s13 = smov 0  }
   0x4   :  { %s1027_s14 = smov 0   ;;  %s1029_s15 = smov 0  }
   0x5 LB: > { %s1044_s16 = sadd.s32 4294967295, %s988_s15   ;;  %s791_s17 = sadd.s32 4294967294, %s988_s15   ;;  %s988_s15 = sphi %s1029_s15, %s1420_s15   ;;  %s984_s14 = sphi %s1027_s14, %s1419_s14   ;;  %s980_s13 = sphi %s1025_s13, %s1418_s13   ;;  %s976_s12 = sphi %s1023_s12, %s1417_s12  }
   0x6   : > { %s1048_s18 = sadd.s32 1, %s988_s15   ;;  %s26_s19 = sadd.s32 1, %s984_s14 }
   0x7   : > { %s23_s20 = ssub.s32 %s988_s15, %s1048_s18  ;;  %p33_p0 = scmp.ne.s32.totalorder %s984_s14, %s980_s13 }
   0x8   : > { %p24_p1 = scmp.eq.s32.totalorder %s23_s20, 0  ;;  %p34_p2 = scmp.eq.s32.totalorder %s988_s15, 0 }
   0x9   : > { %p39_p3 = scmp.ne.s32.totalorder %s980_s13, %s976_s12  ;;  %p40_p4 = scmp.eq.s32.totalorder %s1044_s16, 0 }
   0xa   : > { %s1060_s21 = scalar_select %p24_p1, %s984_s14, %s26_s19  }
   0xb   : > { %p35_p5 = por %p34_p2, %p33_p0  ;;  %p1062_p6 = por %p40_p4, %p39_p3 }
   0xc   : > { %p105_p7 = scmp.eq.s32.totalorder %s1044_s16, 1  ;;  %p111_p8 = scmp.eq.s32.totalorder %s791_s17, 1 }
   0xd   : > { %s1409_s22 = scalar_select %p1062_p6, 1, 0 }
   0xe   : > { %p831_p10 = scmp.lt.s32.totalorder %s988_s15, 2  ;;  %p1069_p11 = por %p105_p7, %p33_p0 }
   0xf   : > { %p1073_p12 = por %p111_p8, %p39_p3  ;;  %s137_s25 = sand.u32 1, %s984_s14  }
  0x10   : > { %s1410_s23 = scalar_select %p1069_p11, 1, 0 }
  0x11   : > { %s1411_s24 = scalar_select %p1073_p12, 1, 0 }
  0x12   : > { %s815_s26 = smul.u32 768, %s988_s15  ;;  %p1084_p13 = pnand %p831_p10, %p35_p5 }
  0x13   : > { %s817_s27 = smul.u32 48, %s137_s25  ;;  %s1090_s7 = scalar_lea.sflag [#allocation3], %s137_s25 }
  0x14   : > { %s1082_s30 = scalar_lea.hbm %s1403_s0, %s815_s26  ;;  %p898_p1 = pneg %p1084_p13 }
  0x15   : > { %s141_s5 = scalar_lea.vmem [#allocation2], %s817_s27  ;;  %s896_s8 = scalar_lea.hbm %s1082_s30, 768 }
  0x16   : > { %s149_s6 = sshll.u32 %s141_s5, 4  ;;  %p897_p0 = scmp.ne.s32.totalorder %s1082_s30, %s896_s8  ;;  %s1088_s6 = int_to_ptr.vmem [resolvable:$true] %s149_s6 }
  0x17   : > { %s901_s11 = scalar_lea.hbm %s1403_s0, 1536  ;;  %p902_p4 = scmp.lt.s32.totalorder %s1082_s30, %s1403_s0 }
  0x18   : > { %p899_p2 = pnand %p898_p1, %p897_p0  ;;  %p903_p5 = scmp.lt.s32.totalorder %s901_s11, %s896_s8 }
  0x1a   : > { %p900_p3 = pneg %p899_p2  ;;  %p904_p7 = por %p903_p5, %p902_p4 }
  0x1c   : > { %p905_p8 = pnand %p904_p7, %p900_p3 }
  0x1e   : > { %908 = shalt.err (!%p905_p8)
}
  0x1f   : > { %s909_s20 = scalar_lea.vmem %s1088_s6, 768  ;;  %s990_s25 = smov [#allocation2]  }
  0x20   : > { %p910_p10 = scmp.ne.s32.totalorder %s1088_s6, %s909_s20  ;;  %s914_s26 = sshll.u32 %s990_s25, 4  ;;  %s915_s26 = int_to_ptr.vmem [resolvable:$false] %s914_s26 }
  0x21   : > { %s916_s27 = scalar_lea.vmem %s915_s26, 1536  ;;  %p917_p2 = scmp.lt.s32.totalorder %s1088_s6, %s915_s26 }
  0x22   : > { %p912_p9 = pnand %p910_p10, %p898_p1  ;;  %p918_p12 = scmp.lt.s32.totalorder %s916_s27, %s909_s20 }
  0x24   : > { %p913_p0 = pneg %p912_p9  ;;  %p919_p11 = por %p918_p12, %p917_p2 }
  0x26   : > { %p920_p6 = pnand %p919_p11, %p913_p0 }
  0x28   : > { %923 = shalt.err (!%p920_p6)
}
  0x29   : > { %s991_s28 = smov 128   ;;  %s992_s29 = smov 8  }
  0x2a   : > { %826 = dma.hbm_to_vmem [thread:$0]  (!%p1084_p13), %s1082_s30, 768, %s1088_s6, %s1090_s7, %s991_s28, %s991_s28, %s992_s29  }
  0x2b   : > { %p796_p9 = scmp.ge.s32.totalorder %s988_s15, 1  ;;  %p157_p1 = scmp.lt.s32.totalorder %s988_s15, 3 }
  0x2d   : > { %p158_p3 = pnand %p796_p9, %p157_p1 }
  0x2e   : > { %s1114_s5 = sand.u32 (!%p158_p3), 1, %s980_s13   ;;  %p1413_p6 = scmp.ne.s32.totalorder (!%p158_p3), %s1409_s22, 0 }
  0x2f   : > { %161 = sbr.rel (%p158_p3) target bundleno = 801 (0x321), region = 32  ;;  %s164_s9 = scalar_lea.sflag (!%p158_p3), [#allocation3], %s1114_s5 }
  0x30   : > { %s818_s8 = smul.u32 (!%p158_p3), 48, %s1114_s5 }
  0x32   : > { %s167_s10 = scalar_lea.vmem (!%p158_p3), [#allocation2], %s818_s8 }
  0x34   : > { %967 = dma.done.wait (%p1413_p6), %s164_s9, 768  }
  0x35   : > { %969 = vsyncadd (%p1413_p6), %s164_s9, 4294966528  ;;  %v198_v0 = vlaneseq  ;;  %v194_v3 = vld [vmem:[%s167_s10 + $0x10] sm:$0xff]  ;;  %v195_v4 = vld [vmem:[%s167_s10 + $0x18] sm:$0xff]  ;;  %v993_v5 = vmov 0.0   ;;  %s994_s22 = smov 16   ;;  %vm292_vm6 = vcmask 1047680  }
  0x36   : > { %v192_v7 = vld [vmem:[%s167_s10] sm:$0xff]  ;;  %v222_v9 = vrot.slane %v194_v3, 7  ;;  %v225_v10 = vrot.slane %v195_v4, 7  ;;  %v241_v11 = vrot.slane %v194_v3, 1  ;;  %v244_v12 = vrot.slane %v195_v4, 1  ;;  %v193_v13 = vld [vmem:[%s167_s10 + $0x8] sm:$0xff] }
  0x37   : > { %v1125_v1 = vshrl.u32 %v198_v0, 7  ;;  %v196_v14 = vld [vmem:[%s167_s10 + $0x20] sm:$0xff]  ;;  %v262_v15 = vmul.f32 2.0, %v195_v4  ;;  %v221_v16 = vrot.slane %v192_v7, 7  ;;  %v224_v17 = vrot.slane %v193_v13, 7  ;;  %v197_v19 = vld [vmem:[%s167_s10 + $0x28] sm:$0xff] }
  0x38   : > { %v240_v18 = vrot.slane %v192_v7, 1  ;;  %v243_v22 = vrot.slane %v193_v13, 1  ;;  %v260_v23 = vmul.f32 2.0, %v193_v13  ;;  %v223_v27 = vrot.slane %v196_v14, 7  ;;  %s283_s30 = smul.u32 3, %s1044_s16  ;;  %s996_s11 = smov 15  }
  0x39   : > { %v200_v2 = vadd.s32 8, %v1125_v1  ;;  %vm203_vm0 = vcmp.ge.s32.totalorder %v1125_v1, 1  ;;  %vm227_vm2 = vcmp.lt.s32.totalorder %v1125_v1, 1  ;;  %vm246_vm3 = vcmp.lt.s32.totalorder %v1125_v1, 7  ;;  %s997_s25 = smov 1   ;;  %s998_s26 = smov 14  }
  0x3a   : > { %v797_v8 = vsel %vm203_vm0, 1.0, %v993_v5  ;;  %v229_v20 = vsel %vm227_vm2, %v222_v9, %v225_v10  ;;  %v251_v21 = vsel %vm246_vm3, %v244_v12, %v241_v11  ;;  %v228_v26 = vsel %vm227_vm2, %v221_v16, %v224_v17  ;;  %s284_s7 = scalar_lea.vmem %s1404_s1, %s283_s30  ;;  %s288_s20 = scalar_lea.vmem %s1405_s2, %s283_s30 }
  0x3b   : > { %vm210_vm1 = vcmp.lt.s32.totalorder %v200_v2, 15  ;;  %v268_v25 = vadd.f32 %v262_v15, %v229_v20  ;;  %v250_v28 = vsel %vm246_vm3, %v243_v22, %v240_v18  ;;  %v266_v29 = vadd.f32 %v260_v23, %v228_v26  ;;  %s999_s27 = smov 113   ;;  %s189_s28 = scalar_lea.vmem [#allocation5], %s818_s8 }
  0x3c   : > { %v798_v6 = vsel %vm210_vm1, 1.0, %v993_v5  ;;  %v226_v30 = vrot.slane %v197_v19, 7  ;;  %v242_v31 = vrot.slane %v196_v14, 1  ;;  %v245_v34 = vrot.slane %v197_v19, 1  ;;  %s714_s29 = sshll.u32 %s189_s28, 4  ;;  %s816_s9 = smul.u32 768, %s1044_s16  ;;  %s1351_s29 = int_to_ptr.vmem [resolvable:$true] %s714_s29 }
  0x3d   : > { %v256_v24 = vmul.f32 %v798_v6, %v251_v21  ;;  %v254_v33 = vmul.f32 %v798_v6, %v250_v28  ;;  %v264_v35 = vmul.f32 2.0, %v197_v19  ;;  %v231_v37 = vsel %vm227_vm2, %v224_v17, %v221_v16  ;;  %v802_v28 = vld [vmem:[%s284_s7 + $0x1] ss:$0 sm:$0xff]  ;;  %s700_s16 = scalar_lea.sflag [#allocation4], %s1114_s5  ;;  %s924_s30 = scalar_lea.vmem %s1351_s29, 768 }
  0x3e   : > { %v230_v36 = vsel %vm227_vm2, %v223_v27, %v226_v30  ;;  %v247_v38 = vsel %vm246_vm3, %v240_v18, %v243_v22  ;;  %v232_v39 = vsel %vm227_vm2, %v225_v10, %v222_v9  ;;  %v252_v41 = vsel %vm246_vm3, %v245_v34, %v242_v31  ;;  %p925_p11 = scmp.ne.s32.totalorder %s1351_s29, %s924_s30  ;;  %p1414_p12 = scmp.ne.s32.totalorder %s1410_s23, 0 }
  0x3f   : > { %v1141_v32 = vadd.f32 %v268_v25, %v256_v24  ;;  %v1153_v40 = vadd.f32 %v266_v29, %v254_v33  ;;  %v270_v42 = vadd.f32 %v264_v35, %v230_v36  ;;  %v234_v43 = vmul.f32 %v797_v8, %v231_v37  ;;  %v801_v35 = vld [vmem:[%s284_s7] ss:$0 sm:$0xff]  ;;  %s1000_s4 = smov [#allocation5]  }
  0x40   : > { %v258_v44 = vmul.f32 %v798_v6, %v252_v41  ;;  %v236_v46 = vmul.f32 %v797_v8, %v232_v39  ;;  %v259_v47 = vmul.f32 2.0, %v192_v7  ;;  %v248_v49 = vsel %vm246_vm3, %v241_v11, %v244_v12  ;;  %v804_v37 = vld [vmem:[%s288_s20] ss:$0 sm:$0xff]  ;;  %v806_v39 = vld [vmem:[%s288_s20 + $0x2] ss:$0 sm:$0xff]  ;;  %p926_p13 = pnand %p925_p11, %p1414_p12  ;;  %s928_s6 = sshll.u32 %s1000_s4, 4  ;;  %s929_s6 = int_to_ptr.vmem [resolvable:$false] %s928_s6 }
  0x41   : > { %302 = vrot.lane.b32.xlu1 %v1141_v32, %s994_s22  ;;  %296 = vrot.lane.b32.xlu0 %v1153_v40, %s994_s22  ;;  %v1159_v45 = vsub.f32 %v234_v43, %v247_v38  ;;  %v233_v50 = vsel %vm227_vm2, %v226_v30, %v223_v27  ;;  %v1169_v51 = vsub.f32 %v228_v26, %v254_v33  ;;  %v261_v52 = vmul.f32 2.0, %v194_v3  ;;  %v803_v30 = vld [vmem:[%s284_s7 + $0x2] ss:$0 sm:$0xff]  ;;  %v805_v33 = vld [vmem:[%s288_s20 + $0x1] ss:$0 sm:$0xff]  ;;  %s930_s7 = scalar_lea.vmem %s929_s6, 1536  ;;  %p931_p5 = scmp.lt.s32.totalorder %s1351_s29, %s929_s6 }
  0x42   : > { %v1161_v48 = vadd.f32 %v270_v42, %v258_v44  ;;  %v1173_v53 = vsub.f32 %v236_v46, %v248_v49  ;;  %v265_v54 = vadd.f32 %v259_v47, %v234_v43  ;;  %v238_v55 = vmul.f32 %v797_v8, %v233_v50  ;;  %p927_p4 = pneg %p926_p13  ;;  %p932_p7 = scmp.lt.s32.totalorder %s930_s7, %s924_s30 }
  0x43   : > { %v263_v56 = vmul.f32 2.0, %v196_v14  ;;  %v1177_v57 = vsub.f32 %v229_v20, %v256_v24  ;;  %v267_v58 = vadd.f32 %v261_v52, %v236_v46  ;;  %v202_v61 = vand.u32 127, %v198_v0 }
  0x44   : > { %v1181_v59 = vadd.f32 %v265_v54, %v247_v38  ;;  %v249_v62 = vsel %vm246_vm3, %v242_v31, %v245_v34  ;;  %v995_v4 = vmov 0   ;;  %v1197_v0 = vsub.f32 %v230_v36, %v258_v44  ;;  %p933_p8 = por %p932_p7, %p931_p5 }
  0x45   : > { %308 = vrot.lane.b32.xlu1 %v1161_v48, %s994_s22  ;;  %418 = vrot.lane.b32.xlu0 %v1159_v45, %s994_s22  ;;  %v269_v60 = vadd.f32 %v263_v56, %v238_v55  ;;  %vm215_vm4 = vcmp.ge.s32.totalorder %v202_v61, 1  ;;  %v1188_v63 = vadd.f32 %v267_v58, %v248_v49  ;;  %v1199_v1 = vsub.f32 %v238_v55, %v249_v62 }
  0x46   : > { %v799_v2 = vsel %vm215_vm4, 1.0, %v993_v5  ;;  %877 = vset.pattern.permute.xlu1 %v995_v4  ;;  %876 = vset.pattern.permute.xlu0 %v995_v4  ;;  %vm218_vm5 = vcmp.lt.s32.totalorder %v202_v61, 15  ;;  %v466_v34 = vmul.f32 2.0, %v1159_v45  ;;  %v468_v36 = vmul.f32 2.0, %v1173_v53  ;;  %p934_p10 = pnand %p933_p8, %p927_p4 }
  0x47   : > { %v1193_v3 = vadd.f32 %v269_v60, %v249_v62  ;;  %v800_v6 = vsel %vm218_vm5, 1.0, %v993_v5  ;;  %v470_v38 = vmul.f32 2.0, %v1199_v1  ;;  %v467_v41 = vmul.f32 2.0, %v1169_v51 }
  0x48   : > { %v469_v42 = vmul.f32 2.0, %v1177_v57  ;;  %v471_v43 = vmul.f32 2.0, %v1197_v0  ;;  %vm619_vm7 = vcmask 253048   ;;  %vm692_vm4 = vcmask 130048  }
  0x49   : > { %421 = vrot.lane.b32.xlu1 %v1169_v51, %s994_s22  ;;  %424 = vrot.lane.b32.xlu0 %v1173_v53, %s994_s22 }
  0x4d   : > { %427 = vrot.lane.b32.xlu1 %v1177_v57, %s994_s22  ;;  %293 = vrot.lane.b32.xlu0 %v1181_v59, %s994_s22 }
  0x51   : > { %299 = vrot.lane.b32.xlu1 %v1188_v63, %s994_s22  ;;  %305 = vrot.lane.b32.xlu0 %v1193_v3, %s994_s22 }
  0x55   : > { %433 = vrot.lane.b32.xlu1 %v1197_v0, %s994_s22  ;;  %430 = vrot.lane.b32.xlu0 %v1199_v1, %s994_s22 }
  0xb3   : > { %v303_v7 = vpop.permute.xlu1 %302  ;;  %v297_v8 = vpop.permute.xlu0 %296 }
  0xb4   : > { %v298_v9 = vsel %vm292_vm6, %v297_v8, %v1153_v40  ;;  %v304_v11 = vsel %vm292_vm6, %v303_v7, %v1141_v32 }
  0xb5   : > { %313 = vrot.lane.b32.xlu1 %v298_v9, %s994_s22 }
  0xb7   : > { %v309_v10 = vpop.permute.xlu1 %308  ;;  %v419_v12 = vpop.permute.xlu0 %418 }
  0xb8   : > { %v420_v13 = vsel %vm292_vm6, %v419_v12, %v1159_v45  ;;  %v310_v14 = vsel %vm292_vm6, %v309_v10, %v1161_v48 }
  0xb9   : > { %317 = vrot.lane.b32.xlu1 %v304_v11, %s994_s22  ;;  %436 = vrot.lane.b32.xlu0 %v420_v13, %s994_s22 }
  0xbb   : > { %v422_v5 = vpop.permute.xlu1 %421  ;;  %v425_v15 = vpop.permute.xlu0 %424 }
  0xbc   : > { %v426_v16 = vsel %vm292_vm6, %v425_v15, %v1173_v53  ;;  %v423_v18 = vsel %vm292_vm6, %v422_v5, %v1169_v51 }
  0xbd   : > { %321 = vrot.lane.b32.xlu1 %v310_v14, %s994_s22  ;;  %440 = vrot.lane.b32.xlu0 %v426_v16, %s994_s22 }
  0xbf   : > { %v428_v17 = vpop.permute.xlu1 %427  ;;  %v294_v19 = vpop.permute.xlu0 %293 }
  0xc0   : > { %v429_v21 = vsel %vm292_vm6, %v428_v17, %v1177_v57  ;;  %v295_v27 = vsel %vm292_vm6, %v294_v19, %v1181_v59 }
  0xc1   : > { %438 = vrot.lane.b32.xlu1 %v423_v18, %s994_s22 }
  0xc3   : > { %v300_v20 = vpop.permute.xlu1 %299  ;;  %v306_v22 = vpop.permute.xlu0 %305 }
  0xc4   : > { %v301_v29 = vsel %vm292_vm6, %v300_v20, %v1188_v63  ;;  %v307_v31 = vsel %vm292_vm6, %v306_v22, %v1193_v3 }
  0xc5   : > { %442 = vrot.lane.b32.xlu1 %v429_v21, %s994_s22 }
  0xc7   : > { %v434_v23 = vpop.permute.xlu1 %433  ;;  %v431_v24 = vpop.permute.xlu0 %430 }
  0xc8   : > { %v435_v25 = vsel %vm292_vm6, %v434_v23, %v1197_v0  ;;  %v432_v26 = vsel %vm292_vm6, %v431_v24, %v1199_v1 }
  0xc9   : > { %446 = vrot.lane.b32.xlu1 %v435_v25, %s994_s22  ;;  %444 = vrot.lane.b32.xlu0 %v432_v26, %s994_s22 }
  0xcd   : > { %330 = vrot.lane.b32.xlu1 %v799_v2, %s996_s11  ;;  %311 = vrot.lane.b32.xlu0 %v295_v27, %s994_s22 }
  0xd1   : > { %399 = vperm.xlu1 %877, %v802_v28   ;;  %315 = vrot.lane.b32.xlu0 %v301_v29, %s994_s22 }
  0xd5   : > { %403 = vperm.xlu1 %877, %v803_v30   ;;  %319 = vrot.lane.b32.xlu0 %v307_v31, %s994_s22  ;;  %s1358_s22 = scalar_lea.hbm %s1406_s3, %s816_s9 }
  0xd9   : > { %552 = vperm.xlu1 %877, %v805_v33   ;;  %340 = vrot.lane.b32.xlu0 %v800_v6, %s997_s25 }
  0xdd   : > { %395 = vperm.xlu0 %876, %v801_v35   ;;  %478 = vrot.lane.b32.xlu1 %v466_v34, %s996_s11 }
  0xe1   : > { %548 = vperm.xlu0 %876, %v804_v37   ;;  %482 = vrot.lane.b32.xlu1 %v468_v36, %s996_s11 }
  0xe5   : > { %556 = vperm.xlu0 %876, %v806_v39   ;;  %486 = vrot.lane.b32.xlu1 %v470_v38, %s996_s11 }
  0xe9   : > { %480 = vrot.lane.b32.xlu0 %v467_v41, %s996_s11 }
  0xed   : > { %484 = vrot.lane.b32.xlu0 %v469_v42, %s996_s11 }
  0xf1   : > { %488 = vrot.lane.b32.xlu0 %v471_v43, %s996_s11 }
 0x127   : > { %v314_v49 = vpop.permute.xlu1 %313 }
 0x128   : > { %v1266_v58 = vsel %vm292_vm6, %v314_v49, %v1153_v40 }
 0x12b   : > { %v437_v44 = vpop.permute.xlu0 %436  ;;  %v318_v54 = vpop.permute.xlu1 %317 }
 0x12c   : > { %v448_v60 = vsel %vm292_vm6, %v437_v44, %v1159_v45  ;;  %v1275_v4 = vsel %vm292_vm6, %v318_v54, %v1141_v32 }
 0x12f   : > { %v441_v46 = vpop.permute.xlu0 %440  ;;  %v322_v56 = vpop.permute.xlu1 %321 }
 0x130   : > { %v450_v40 = vsel %vm292_vm6, %v441_v46, %v1173_v53  ;;  %v1284_v8 = vsel %vm292_vm6, %v322_v56, %v1161_v48 }
 0x133   : > { %v439_v6 = vpop.permute.xlu1 %438 }
 0x134   : > { %v449_v53 = vsel %vm292_vm6, %v439_v6, %v1169_v51 }
 0x137   : > { %v443_v11 = vpop.permute.xlu1 %442 }
 0x13b   : > { %v445_v47 = vpop.permute.xlu0 %444  ;;  %v447_v14 = vpop.permute.xlu1 %446 }
 0x13c   : > { %v453_v51 = vsel %vm292_vm6, %v447_v14, %v1197_v0 }
 0x13f   : > { %v312_v50 = vpop.permute.xlu0 %311 }
 0x140   : > { %v323_v9 = vsel %vm292_vm6, %v312_v50, %v1181_v59  ;;  %v451_v59 = vsel %vm292_vm6, %v443_v11, %v1177_v57  ;;  %v331_v57 = vpop.permute.xlu1 %330 }
 0x141   : > { %v454_v30 = vmul.f32 %v448_v60, %v331_v57  ;;  %v456_v33 = vmul.f32 %v450_v40, %v331_v57  ;;  %v334_v38 = vmul.f32 %v331_v57, %v1266_v58  ;;  %v333_v39 = vmul.f32 %v331_v57, %v323_v9 }
 0x142   : > { %v455_v46 = vmul.f32 %v449_v53, %v331_v57  ;;  %v336_v50 = vmul.f32 %v331_v57, %v1275_v4  ;;  %v457_v56 = vmul.f32 %v451_v59, %v331_v57 }
 0x143   : > { %v316_v52 = vpop.permute.xlu0 %315 }
 0x144   : > { %v325_v12 = vsel %vm292_vm6, %v316_v52, %v1188_v63  ;;  %v452_v63 = vsel %vm292_vm6, %v445_v47, %v1199_v1 }
 0x147   : > { %v320_v55 = vpop.permute.xlu0 %319 }
 0x148   : > { %v327_v5 = vsel %vm292_vm6, %v320_v55, %v1193_v3  ;;  %v335_v55 = vmul.f32 %v331_v57, %v325_v12 }
 0x149   : > { %v337_v11 = vmul.f32 %v331_v57, %v327_v5 }
 0x14b   : > { %v341_v61 = vpop.permute.xlu0 %340 }
 0x14c   : > { %v344_v62 = vmul.f32 %v341_v61, %v1266_v58  ;;  %v460_v2 = vmul.f32 %v448_v60, %v341_v61  ;;  %v346_v7 = vmul.f32 %v341_v61, %v1275_v4  ;;  %v462_v45 = vmul.f32 %v450_v40, %v341_v61  ;;  %v400_v3 = vpop.permute.xlu1 %399 }
 0x14d   : > { %v348_v32 = vmul.f32 %v341_v61, %v1284_v8  ;;  %v343_v10 = vmul.f32 %v341_v61, %v323_v9  ;;  %v461_v13 = vmul.f32 %v449_v53, %v341_v61  ;;  %v345_v48 = vmul.f32 %v341_v61, %v325_v12 }
 0x14e   : > { %357 = vrot.lane.b32.xlu0 %v344_v62, %s998_s26  ;;  %508 = vrot.lane.b32.xlu1 %v460_v2, %s998_s26  ;;  %v463_v15 = vmul.f32 %v451_v59, %v341_v61  ;;  %v347_v16 = vmul.f32 %v341_v61, %v327_v5  ;;  %v465_v17 = vmul.f32 %v453_v51, %v341_v61 }
 0x14f   : > { %v464_v18 = vmul.f32 %v452_v63, %v341_v61  ;;  %v458_v9 = vmul.f32 %v452_v63, %v331_v57 }
 0x150   : > { %v1309_v20 = vpop.permute.xlu1 %403 }
 0x152   : > { %361 = vrot.lane.b32.xlu0 %v346_v7, %s998_s26  ;;  %512 = vrot.lane.b32.xlu1 %v462_v45, %s998_s26 }
 0x154   : > { %v553_v0 = vpop.permute.xlu1 %552 }
 0x156   : > { %365 = vrot.lane.b32.xlu0 %v348_v32, %s998_s26  ;;  %355 = vrot.lane.b32.xlu1 %v343_v10, %s998_s26  ;;  %v459_v32 = vmul.f32 %v453_v51, %v331_v57  ;;  %v338_v10 = vmul.f32 %v331_v57, %v1284_v8 }
 0x158   : > { %v396_v19 = vpop.permute.xlu0 %395  ;;  %v479_v23 = vpop.permute.xlu1 %478 }
 0x159   : > { %v496_v31 = vadd.f32 %v479_v23, %v454_v30 }
 0x15a   : > { %510 = vrot.lane.b32.xlu0 %v461_v13, %s998_s26  ;;  %359 = vrot.lane.b32.xlu1 %v345_v48, %s998_s26 }
 0x15c   : > { %v549_v21 = vpop.permute.xlu0 %548  ;;  %v483_v25 = vpop.permute.xlu1 %482 }
 0x15d   : > { %v498_v37 = vadd.f32 %v483_v25, %v456_v33 }
 0x15e   : > { %514 = vrot.lane.b32.xlu0 %v463_v15, %s998_s26  ;;  %363 = vrot.lane.b32.xlu1 %v347_v16, %s998_s26 }
 0x160   : > { %v1311_v22 = vpop.permute.xlu0 %556  ;;  %v487_v1 = vpop.permute.xlu1 %486 }
 0x161   : > { %v500_v63 = vadd.f32 %v487_v1, %v458_v9 }
 0x162   : > { %518 = vrot.lane.b32.xlu0 %v465_v17, %s998_s26  ;;  %516 = vrot.lane.b32.xlu1 %v464_v18, %s998_s26 }
 0x164   : > { %v481_v24 = vpop.permute.xlu0 %480 }
 0x165   : > { %v497_v52 = vadd.f32 %v481_v24, %v455_v46 }
 0x168   : > { %v485_v26 = vpop.permute.xlu0 %484 }
 0x169   : > { %v499_v53 = vadd.f32 %v485_v26, %v457_v56 }
 0x16c   : > { %v489_v27 = vpop.permute.xlu0 %488 }
 0x16d   : > { %v501_v51 = vadd.f32 %v489_v27, %v459_v32 }
 0x1c0   : > { %v509_v28 = vpop.permute.xlu1 %508  ;;  %v358_v29 = vpop.permute.xlu0 %357 }
 0x1c1   : > { %v526_v36 = vadd.f32 %v509_v28, %v496_v31  ;;  %v374_v41 = vsub.f32 %v334_v38, %v358_v29 }
 0x1c3   : > { %v559_v47 = vadd.f32 %v549_v21, %v526_v36  ;;  %v407_v60 = vadd.f32 %v396_v19, %v374_v41 }
 0x1c4   : > { %v513_v34 = vpop.permute.xlu1 %512  ;;  %v362_v35 = vpop.permute.xlu0 %361 }
 0x1c5   : > { %v528_v42 = vadd.f32 %v513_v34, %v498_v37  ;;  %v376_v62 = vsub.f32 %v336_v50, %v362_v35  ;;  %v565_v58 = vmul.f32 %v559_v47, %v559_v47  ;;  %v413_v48 = vmul.f32 %v407_v60, %v407_v60 }
 0x1c7   : > { %v561_v61 = vadd.f32 %v553_v0, %v528_v42  ;;  %v409_v14 = vadd.f32 %v400_v3, %v376_v62 }
 0x1c8   : > { %v356_v43 = vpop.permute.xlu1 %355  ;;  %v366_v44 = vpop.permute.xlu0 %365 }
 0x1c9   : > { %v373_v49 = vsub.f32 %v333_v39, %v356_v43  ;;  %v567_v59 = vmul.f32 %v561_v61, %v561_v61  ;;  %v378_v15 = vsub.f32 %v338_v10, %v366_v44  ;;  %v415_v57 = vmul.f32 %v409_v14, %v409_v14 }
 0x1cb   : > { %v406_v54 = vadd.f32 %v396_v19, %v373_v49  ;;  %v411_v26 = vadd.f32 %v1309_v20, %v378_v15 }
 0x1cc   : > { %v360_v2 = vpop.permute.xlu1 %359  ;;  %v511_v40 = vpop.permute.xlu0 %510 }
 0x1cd   : > { %v412_v6 = vmul.f32 %v406_v54, %v406_v54  ;;  %v375_v7 = vsub.f32 %v335_v55, %v360_v2  ;;  %v527_v45 = vadd.f32 %v511_v40, %v497_v52 }
 0x1cf   : > { %v1316_v4 = vadd.f32 %v565_v58, %v412_v6  ;;  %v408_v13 = vadd.f32 %v400_v3, %v375_v7  ;;  %v560_v12 = vadd.f32 %v549_v21, %v527_v45 }
 0x1d0   : > { %v364_v16 = vpop.permute.xlu1 %363  ;;  %v515_v17 = vpop.permute.xlu0 %514 }
 0x1d1   : > { %v414_v18 = vmul.f32 %v408_v13, %v408_v13  ;;  %v566_v19 = vmul.f32 %v560_v12, %v560_v12  ;;  %v377_v23 = vsub.f32 %v337_v11, %v364_v16  ;;  %v529_v24 = vadd.f32 %v515_v17, %v499_v53 }
 0x1d2   : > { %878 = vrsqrt.f32 %v1316_v4  ;;  %vm579_vm11 = vcmp.eq.f32.partialorder %v1316_v4, inf  ;;  %v582_v58 = vand.u32 2147483648, %v1316_v4  ;;  %vm581_vm0 = vcmp.eq.f32.partialorder %v1316_v4, 0.0 }
 0x1d3   : > { %v573_v25 = vadd.f32 %v567_v59, %v414_v18  ;;  %v572_v8 = vadd.f32 %v566_v19, %v413_v48  ;;  %v562_v5 = vadd.f32 %v553_v0, %v529_v24  ;;  %v410_v3 = vadd.f32 %v1309_v20, %v377_v23 }
 0x1d4   : > { %v517_v28 = vpop.permute.xlu1 %516  ;;  %v519_v21 = vpop.permute.xlu0 %518  ;;  %v417_v0 = vmul.f32 %v411_v26, %v411_v26 }
 0x1d5   : > { %v568_v29 = vmul.f32 %v562_v5, %v562_v5  ;;  %v530_v30 = vadd.f32 %v517_v28, %v500_v63  ;;  %v531_v31 = vadd.f32 %v519_v21, %v501_v51  ;;  %880 = vrsqrt.f32 %v572_v8 }
 0x1d6   : > { %882 = vrsqrt.f32 %v573_v25  ;;  %v416_v34 = vmul.f32 %v410_v3, %v410_v3  ;;  %vm586_vm8 = vcmp.eq.f32.partialorder %v572_v8, inf  ;;  %v589_v43 = vand.u32 2147483648, %v572_v8 }
 0x1d7   : > { %v574_v33 = vadd.f32 %v568_v29, %v415_v57  ;;  %v563_v1 = vadd.f32 %v1311_v22, %v530_v30  ;;  %v564_v27 = vadd.f32 %v1311_v22, %v531_v31  ;;  %vm588_vm9 = vcmp.eq.f32.partialorder %v572_v8, 0.0 }
 0x1d8   : > { %vm593_vm10 = vcmp.eq.f32.partialorder %v573_v25, inf  ;;  %v596_v52 = vand.u32 2147483648, %v573_v25  ;;  %vm595_vm12 = vcmp.eq.f32.partialorder %v573_v25, 0.0 }
 0x1d9   : > { %v569_v35 = vmul.f32 %v563_v1, %v563_v1  ;;  %v570_v36 = vmul.f32 %v564_v27, %v564_v27  ;;  %884 = vrsqrt.f32 %v574_v33  ;;  %vm600_vm13 = vcmp.eq.f32.partialorder %v574_v33, inf }
 0x1da   : > { %v603_v56 = vand.u32 2147483648, %v574_v33  ;;  %vm602_vm14 = vcmp.eq.f32.partialorder %v574_v33, 0.0 }
 0x1db   : > { %v575_v37 = vadd.f32 %v569_v35, %v416_v34  ;;  %v576_v38 = vadd.f32 %v570_v36, %v417_v0 }
 0x1dd   : > { %886 = vrsqrt.f32 %v575_v37  ;;  %vm607_vm15 = vcmp.eq.f32.partialorder %v575_v37, inf  ;;  %v610_v32 = vand.u32 2147483648, %v575_v37  ;;  %vm609_vm1 = vcmp.eq.f32.partialorder %v575_v37, 0.0 }
 0x1de   : > { %888 = vrsqrt.f32 %v576_v38  ;;  %vm614_vm2 = vcmp.eq.f32.partialorder %v576_v38, inf  ;;  %v617_v48 = vand.u32 2147483648, %v576_v38  ;;  %vm616_vm3 = vcmp.eq.f32.partialorder %v576_v38, 0.0 }
 0x1df   : > { %v879_v20 = vpop.eup %878 }
 0x1e0   : > { %v578_v22 = vmul.f32 %v879_v20, %v1316_v4 }
 0x1e2   : > { %v881_v39 = vpop.eup %880  ;;  %v580_v62 = vsel %vm579_vm11, %v1316_v4, %v578_v22 }
 0x1e3   : > { %v883_v41 = vpop.eup %882  ;;  %v585_v42 = vmul.f32 %v881_v39, %v572_v8  ;;  %v583_v10 = vsel %vm581_vm0, %v582_v58, %v580_v62 }
 0x1e4   : > { %v592_v44 = vmul.f32 %v883_v41, %v573_v25  ;;  %v620_v14 = vsel %vm619_vm7, %v583_v10, -inf }
 0x1e5   : > { %v587_v47 = vsel %vm586_vm8, %v572_v8, %v585_v42 }
 0x1e6   : > { %v885_v46 = vpop.eup %884  ;;  %v1325_v49 = vsel %vm588_vm9, %v589_v43, %v587_v47  ;;  %v594_v50 = vsel %vm593_vm10, %v573_v25, %v592_v44 }
 0x1e7   : > { %v599_v54 = vmul.f32 %v885_v46, %v574_v33  ;;  %v623_v55 = vsel %vm619_vm7, %v1325_v49, -inf  ;;  %v1329_v60 = vsel %vm595_vm12, %v596_v52, %v594_v50 }
 0x1e8   : > { %624 = vmax.xlane.f32.xlu0 %v623_v55  ;;  %v626_v9 = vsel %vm619_vm7, %v1329_v60, -inf }
 0x1e9   : > { %v601_v61 = vsel %vm600_vm13, %v574_v33, %v599_v54 }
 0x1ea   : > { %v887_v2 = vpop.eup %886  ;;  %v1332_v40 = vsel %vm602_vm14, %v603_v56, %v601_v61 }
 0x1eb   : > { %v889_v6 = vpop.eup %888  ;;  %v629_v7 = vsel %vm619_vm7, %v1332_v40, -inf  ;;  %v606_v45 = vmul.f32 %v887_v2, %v575_v37 }
 0x1ec   : > { %630 = vmax.xlane.f32.xlu1 %v629_v7  ;;  %v613_v11 = vmul.f32 %v889_v6, %v576_v38  ;;  %627 = vmax.xlane.f32.xlu0 %v626_v9 }
 0x1ed   : > { %v608_v53 = vsel %vm607_vm15, %v575_v37, %v606_v45 }
 0x1ee   : > { %v611_v13 = vsel %vm609_vm1, %v610_v32, %v608_v53  ;;  %v615_v12 = vsel %vm614_vm2, %v576_v38, %v613_v11 }
 0x1ef   : > { %v632_v59 = vsel %vm619_vm7, %v611_v13, -inf  ;;  %v618_v4 = vsel %vm616_vm3, %v617_v48, %v615_v12 }
 0x1f0   : > { %621 = vmax.xlane.f32.xlu1 %v620_v14  ;;  %633 = vmax.xlane.f32.xlu0 %v632_v59  ;;  %v635_v15 = vsel %vm619_vm7, %v618_v4, -inf }
 0x1f4   : > { %636 = vmax.xlane.f32.xlu1 %v635_v15 }
 0x271   : > { %v625_v16 = vpop.xlane.xlu0 %624 }
 0x275   : > { %v631_v17 = vpop.xlane.xlu1 %630  ;;  %v628_v18 = vpop.xlane.xlu0 %627 }
 0x276   : > { %v645_v19 = vmax.f32 %v628_v18, %v631_v17 }
 0x278   : > { %v646_v23 = vrot.slane %v645_v19, 4 }
 0x279   : > { %v622_v24 = vpop.xlane.xlu1 %621  ;;  %v634_v5 = vpop.xlane.xlu0 %633 }
 0x27a   : > { %v638_v63 = vmax.f32 %v622_v24, %v625_v16  ;;  %v647_v51 = vmax.f32 %v645_v19, %v646_v23 }
 0x27c   : > { %v639_v25 = vrot.slane %v638_v63, 4  ;;  %v648_v8 = vrot.slane %v647_v51, 2 }
 0x27d   : > { %v637_v57 = vpop.xlane.xlu1 %636 }
 0x27e   : > { %v640_v26 = vmax.f32 %v638_v63, %v639_v25  ;;  %v652_v28 = vmax.f32 %v634_v5, %v637_v57  ;;  %v649_v21 = vmax.f32 %v647_v51, %v648_v8 }
 0x280   : > { %v641_v3 = vrot.slane %v640_v26, 2  ;;  %v653_v29 = vrot.slane %v652_v28, 4  ;;  %v650_v30 = vrot.slane %v649_v21, 1 }
 0x282   : > { %v642_v31 = vmax.f32 %v640_v26, %v641_v3  ;;  %v654_v33 = vmax.f32 %v652_v28, %v653_v29  ;;  %v651_v0 = vmax.f32 %v649_v21, %v650_v30 }
 0x284   : > { %v643_v1 = vrot.slane %v642_v31, 1  ;;  %v655_v27 = vrot.slane %v654_v33, 2 }
 0x286   : > { %v644_v34 = vmax.f32 %v642_v31, %v643_v1  ;;  %v656_v35 = vmax.f32 %v654_v33, %v655_v27 }
 0x288   : > { %890 = vrcp.f32 %v644_v34  ;;  %v657_v36 = vrot.slane %v656_v35, 1 }
 0x289   : > { %892 = vrcp.f32 %v651_v0 }
 0x28a   : > { %v658_v37 = vmax.f32 %v656_v35, %v657_v36 }
 0x28c   : > { %894 = vrcp.f32 %v658_v37 }
 0x295   : > { %v891_v38 = vpop.eup %890 }
 0x296   : > { %v663_v20 = vmul.f32 %v891_v38, %v1325_v49  ;;  %v662_v39 = vmul.f32 %v891_v38, %v583_v10  ;;  %v893_v41 = vpop.eup %892 }
 0x297   : > { %v665_v42 = vmul.f32 %v893_v41, %v1332_v40  ;;  %v664_v43 = vmul.f32 %v893_v41, %v1329_v60 }
 0x298   : > { %676 = vrot.lane.b32.xlu1 %v663_v20, %s999_s27  ;;  %674 = vrot.lane.b32.xlu0 %v662_v39, %s999_s27 }
 0x299   : > { %v895_v44 = vpop.eup %894 }
 0x29a   : > { %v667_v22 = vmul.f32 %v895_v44, %v618_v4  ;;  %v666_v46 = vmul.f32 %v895_v44, %v611_v13 }
 0x29c   : > { %680 = vrot.lane.b32.xlu0 %v665_v42, %s999_s27  ;;  %678 = vrot.lane.b32.xlu1 %v664_v43, %s999_s27 }
 0x2a0   : > { %684 = vrot.lane.b32.xlu0 %v667_v22, %s999_s27  ;;  %682 = vrot.lane.b32.xlu1 %v666_v46, %s999_s27 }
 0x30a   : > { %v677_v47 = vpop.permute.xlu1 %676  ;;  %v675_v49 = vpop.permute.xlu0 %674 }
 0x30b   : > { %694 = vst.msk [vmem:[%s189_s28 + $0x8] sm:$0xff] %vm692_vm4, %v677_v47  ;;  %693 = vst.msk [vmem:[%s189_s28] sm:$0xff] %vm692_vm4, %v675_v49 }
 0x30e   : > { %v679_v50 = vpop.permute.xlu1 %678  ;;  %v681_v52 = vpop.permute.xlu0 %680 }
 0x30f   : > { %695 = vst.msk [vmem:[%s189_s28 + $0x10] sm:$0xff] %vm692_vm4, %v679_v50  ;;  %696 = vst.msk [vmem:[%s189_s28 + $0x18] sm:$0xff] %vm692_vm4, %v681_v52 }
 0x312   : > { %v683_v54 = vpop.permute.xlu1 %682  ;;  %v685_v55 = vpop.permute.xlu0 %684 }
 0x313   : > { %697 = vst.msk [vmem:[%s189_s28 + $0x20] sm:$0xff] %vm692_vm4, %v683_v54  ;;  %698 = vst.msk [vmem:[%s189_s28 + $0x28] sm:$0xff] %vm692_vm4, %v685_v55 }
 0x314   : > { %937 = shalt.err (!%p934_p10)
}
 0x315   : > { %s938_s11 = scalar_lea.hbm %s1358_s22, 768  ;;  %s942_s20 = scalar_lea.hbm %s1406_s3, 1536 }
 0x316   : > { %p939_p0 = scmp.ne.s32.totalorder %s1358_s22, %s938_s11  ;;  %p943_p1 = scmp.lt.s32.totalorder %s1358_s22, %s1406_s3 }
 0x317   : > { %p944_p3 = scmp.lt.s32.totalorder %s942_s20, %s938_s11 }
 0x318   : > { %p940_p2 = pnand %p939_p0, %p1414_p12 }
 0x319   : > { %p945_p6 = por %p944_p3, %p943_p1 }
 0x31a   : > { %p941_p9 = pneg %p940_p2 }
 0x31c   : > { %p946_p11 = pnand %p945_p6, %p941_p9 }
 0x31e   : > { %949 = shalt.err (!%p946_p11)
}
 0x31f   : > { %s1001_s27 = smov 128   ;;  %s1002_s28 = smov 8  }
 0x320   : > { %821 = dma.vmem_to_hbm [thread:$0]  (%p1414_p12), %s1351_s29, 768, %s1358_s22, %s700_s16, %s1001_s27, %s1001_s27, %s1002_s28  }
 0x321 PF: > { %s729_s9 = sand.u32 1, %s976_s12   ;;  %p1415_p13 = scmp.ne.s32.totalorder %s1411_s24, 0 }
 0x322   : > { %p1416_p4 = scmp.ge.s32.totalorder %s988_s15, 2  ;;  %s730_s10 = scalar_lea.sflag [#allocation4], %s729_s9 }
 0x324   : > { %p828_p5 = pnand %p1416_p4, %p1415_p13 }
 0x326   : > { %p829_p7 = pneg %p828_p5 }
 0x328   : > { %971 = dma.done.wait (%p829_p7), %s730_s10, 768  }
 0x329   : > { %973 = vsyncadd (%p829_p7), %s730_s10, 4294966528  ;;  %p16_p8 = scmp.ge.s32.totalorder %s1048_s18, 4   ;;  %s1417_s12 = smov %s980_s13 }
 0x32a   : > { %s1418_s13 = smov %s984_s14  ;;  %s1419_s14 = smov %s1060_s21 }
 0x32b   : > { %s1420_s15 = smov %s1048_s18  ;;  %18 = sbr.rel (!%p16_p8) target bundleno = 5 (0x5), region = 79 }
 0x330   :  { %735 = vsyncpa [#allocation3], 1 }
 0x331   :  { %737 = vsyncpa [#allocation3 + $0x1], 1 }
 0x332   :  { %738 = vsyncpa [#allocation4], 1 }
 0x333   :  { %740 = vsyncpa [#allocation4 + $0x1], 1 }

</bundles_post_ra>
